<compile_context>
chip_gen: v5e
topology: v5e:2x2
jax: 0.10.0
libtpu: 0.0.40
codegen_flags: <defaults>
</compile_context>

<pallas_src>
import jax
import jax.numpy as jnp
from jax.experimental import pallas as pl
from jax.experimental.pallas import tpu as pltpu


# ----------------------------- kernels --------------------------------------
def _make_const_kernel(s_val: float):
    """Scalar baked in at compile time -> VPU immediate, no SMEM input."""
    def kernel(a_ref, o_ref):
        o_ref[...] = a_ref[...] * jnp.asarray(s_val, dtype=o_ref.dtype)
    return kernel


def _dyn_kernel(s_ref, a_ref, o_ref):
    # s arrives as float32 in SMEM (32-bit scalar memory); cast to data dtype.
    o_ref[...] = a_ref[...] * s_ref[0, 0].astype(o_ref.dtype)


# ----------------------------- heuristics -----------------------------------
_WIDTHS = (8192, 4096, 2048, 1024, 512, 256, 128)


def _choose_width(size):
    """Largest lane-dense row width (multiple of 128) that divides `size`."""
    for w in _WIDTHS:
        if size % w == 0 and size // w >= 8:
            return w
    for w in _WIDTHS:
        if size % w == 0:
            return w
    return None


def _vmem_budget():
    """(tile_budget, vmem_limit) in bytes, per TPU generation."""
    try:
        cap = int(pltpu.get_tpu_info().vmem_capacity_bytes)
    except Exception:
        cap = 128 << 20  # v5e/v6e physical VMEM fallback
    if cap <= (64 << 20):                 # v7x: 64 MiB per TensorCore
        tile_budget, vmem_limit = 44 << 20, 56 << 20
    else:                                 # v5e / v6e: 128 MiB
        tile_budget, vmem_limit = 64 << 20, 80 << 20
    return tile_budget, min(vmem_limit, cap)


def _choose_tm(M, N, itemsize, tile_budget):
    """Row-tile size: VMEM-budgeted, sublane-aligned, megacore-balanced."""
    sub = {4: 8, 2: 16, 1: 32}.get(itemsize, 8)   # sublane multiple per dtype
    # Largest tm such that (in + out) x double-buffered tiles fit the budget.
    max_tm = tile_budget // (4 * N * itemsize)
    max_tm = max(sub, (max_tm // sub) * sub)

    if M <= max_tm:
        # Whole slab fits in one tile.  Split rows across 2 grid steps when
        # possible so both v7x TensorCores get work (negligible cost elsewhere).
        if M >= 2 * sub:
            half = pl.cdiv(pl.cdiv(M, 2), sub) * sub
            return min(half, max_tm)
        return M

    def balanced(cand):
        steps = pl.cdiv(M, cand)
        return steps % 2 == 0 or steps >= 8

    # 1) Near max_tm (shrink at most 8 sublane groups), prefer a tm that
    #    divides M (no masked edge tile) and keeps the grid balanced.
    near_lo = max(sub, max_tm - 8 * sub)
    for cand in range(max_tm, near_lo - 1, -sub):
        if M % cand == 0 and balanced(cand):
            return cand
    for cand in range(max_tm, near_lo - 1, -sub):
        if M % cand == 0:
            return cand
    # 2) Otherwise just keep the grid-step count even (or >= 8) for 2-TC
    #    balance, shrinking the tile at most 2x.
    far_lo = max(sub, (max_tm // 2 // sub) * sub)
    for cand in range(max_tm, far_lo - 1, -sub):
        if balanced(cand):
            return cand
    return max_tm


# ----------------------------- wrapper ---------------------------------------
def matrix_scalar_mul(A: jax.Array, s) -> jax.Array:
    """Compute A * s with a Pallas TPU kernel (any-rank A; elementwise)."""
    orig_shape = A.shape
    dtype = A.dtype
    size = int(A.size)
    itemsize = jnp.dtype(dtype).itemsize

    # --- Canonicalize to one contiguous lane-dense slab ----------------------
    W = _choose_width(size)
    pad = 0
    if W is None:
        # size not a multiple of 128: pad the flat view up to an (8*128)-element
        # multiple (cheap extra pass on an awkward shape), run, slice back.
        W = 128
        padded = pl.cdiv(size, 8 * 128) * (8 * 128)
        pad = padded - size
        A2 = jnp.pad(A.reshape(-1), (0, pad)).reshape(padded // W, W)
    else:
        A2 = A.reshape(size // W, W)
    M, N = A2.shape

    tile_budget, vmem_limit = _vmem_budget()
    tm = _choose_tm(M, N, itemsize, tile_budget)
    grid = (pl.cdiv(M, tm),)
    block = pl.BlockSpec((tm, N), lambda i: (i, 0))
    out_shape = jax.ShapeDtypeStruct((M, N), dtype)
    cparams = pltpu.CompilerParams(
        dimension_semantics=("parallel",),
        vmem_limit_bytes=vmem_limit,
    )

    if isinstance(s, (int, float)):
        # Compile-time constant scalar: no SMEM input path at all.
        out = pl.pallas_call(
            _make_const_kernel(float(s)),
            out_shape=out_shape,
            grid_spec=pl.GridSpec(grid=grid, in_specs=[block], out_specs=block),
            compiler_params=cparams,
        )(A2)
    else:
        # Dynamic scalar: pass as float32 through SMEM and cast in-kernel.
        s_arr = jnp.asarray(s, dtype=jnp.float32).reshape(1, 1)
        out = pl.pallas_call(
            _dyn_kernel,
            out_shape=out_shape,
            grid_spec=pl.GridSpec(
                grid=grid,
                in_specs=[pl.BlockSpec(memory_space=pltpu.MemorySpace.SMEM), block],
                out_specs=block,
            ),
            compiler_params=cparams,
        )(s_arr, A2)

    out = out.reshape(-1)
    if pad:
        out = out[:size]
    return out.reshape(orig_shape)


if __name__ == "__main__":
    key = jax.random.PRNGKey(0)
    # Small shape consistent with the module: a plain float32 matrix.
    M, N = 256, 256
    A = jax.random.normal(key, (M, N), dtype=jnp.float32)
    s = 3.5

    out = jax.block_until_ready(matrix_scalar_mul(A, s))
    expected = A * jnp.float32(s)
    assert out.shape == A.shape and out.dtype == A.dtype
    assert jnp.allclose(out, expected, rtol=1e-6, atol=1e-6)

    # Dynamic-scalar (SMEM) path.
    s_dyn = jnp.asarray(1.25, dtype=jnp.float32)
    out2 = jax.block_until_ready(matrix_scalar_mul(A, s_dyn))
    assert jnp.allclose(out2, A * 1.25, rtol=1e-6, atol=1e-6)

    # Awkward non-128-aligned shape (pad + slice fallback).
    B = jax.random.normal(jax.random.PRNGKey(1), (7, 33), dtype=jnp.float32)
    out3 = jax.block_until_ready(matrix_scalar_mul(B, 0.5))
    assert out3.shape == B.shape
    assert jnp.allclose(out3, B * 0.5, rtol=1e-6, atol=1e-6)

    print("KERNEL_OK")
</pallas_src>

<mosaic_0001>
module attributes {stable_mosaic.version = 11 : i64} {
  func.func @kernel(%arg0: i32, %arg1: memref<8x8192xf32, #tpu.memory_space<vmem>>, %arg2: memref<8x8192xf32, #tpu.memory_space<vmem>>) attributes {dimension_semantics = [#tpu.dimension_semantics<parallel>], iteration_bounds = array<i64: 1>, scalar_prefetch = 0 : i64, scratch_operands = 0 : i64, tpu.core_type = #tpu.core_type<tc>, window_params = [{transform_indices = @transform_0, window_bounds = array<i64: 8, 8192>}, {transform_indices = @transform_1, window_bounds = array<i64: 8, 8192>}]} {
    %c0 = arith.constant 0 : index
    %c0_0 = arith.constant 0 : index
    %0 = vector.load %arg1[%c0, %c0_0] : memref<8x8192xf32, #tpu.memory_space<vmem>>, vector<8x8192xf32>
    %cst = arith.constant 3.500000e+00 : f32
    %1 = vector.broadcast %cst : f32 to vector<8x8192xf32>
    %2 = arith.mulf %0, %1 : vector<8x8192xf32>
    %c0_1 = arith.constant 0 : index
    %c0_2 = arith.constant 0 : index
    %3 = vector.load %arg2[%c0_1, %c0_2] : memref<8x8192xf32, #tpu.memory_space<vmem>>, vector<8x8192xf32>
    tpu.vector_store %arg2[%c0_1, %c0_2], %2 {strides = array<i32>} : memref<8x8192xf32, #tpu.memory_space<vmem>>, vector<8x8192xf32>,
    return
  }
  func.func @transform_0(%arg0: i32) -> (i32, i32) {
    %c0_i32 = arith.constant 0 : i32
    %c0_i32_0 = arith.constant 0 : i32
    return %arg0, %c0_i32 : i32, i32
  }
  func.func @transform_1(%arg0: i32) -> (i32, i32) {
    %c0_i32 = arith.constant 0 : i32
    %c0_i32_0 = arith.constant 0 : i32
    return %arg0, %c0_i32 : i32, i32
  }
}

</mosaic_0001>

<bundles_post_ra>
// kernel: tpu_custom_call.1
= control target key start
LH: loop header
LB: loop body
LE: loop exit
PB: predicated region body
PF: predicated region fallthrough
CT: control target
= control target key end

     0   :  { %6 = vsyncpa [#allocation3], 0  ;;  %s304_s0 = inlined_call_operand.hbm [shape: f32[8,8192], index: 0, kind: input, shape index: {}]   ;;  %s305_s1 = inlined_call_operand.hbm [shape: f32[8,8192], index: 1, kind: output, shape index: {}]  }
   0x1   :  { %7 = vsyncpa [#allocation4], 0  ;;  %s13_s8 = sshll.u32 %s304_s0, 4  ;;  %s286_s9 = smov [#allocation2]   ;;  %s14_s8 = int_to_ptr.hbm [resolvable:$true] %s13_s8 }
   0x2   :  { %s15_s10 = sshll.u32 %s286_s9, 4  ;;  %s16_s10 = int_to_ptr.vmem [resolvable:$true] %s15_s10 }
   0x3   :  { %18 = dma.hbm_to_vmem [thread:$0]  %s14_s8, 8192, %s16_s10, [#allocation3]  }
   0x4   :  { %282 = dma.done.wait [#allocation3], 8192  }
   0x5   :  { %283 = vsyncadd [#allocation3], 4294959104  ;;  %v23_v0 = vld [vmem:[#allocation2] sm:$0xff]  ;;  %v24_v1 = vld [vmem:[#allocation2 + $0x8] sm:$0xff]  ;;  %s287_s0 = smov [#allocation5]   ;;  %s222_s14 = sshll.u32 %s305_s1, 4  ;;  %s223_s14 = int_to_ptr.hbm [resolvable:$true] %s222_s14 }
   0x6   :  { %v25_v2 = vld [vmem:[#allocation2 + $0x10] sm:$0xff]  ;;  %v87_v3 = vmul.f32 3.5, %v23_v0  ;;  %v88_v4 = vmul.f32 3.5, %v24_v1  ;;  %v26_v6 = vld [vmem:[#allocation2 + $0x18] sm:$0xff]  ;;  %v27_v7 = vld [vmem:[#allocation2 + $0x20] sm:$0xff]  ;;  %s220_s11 = sshll.u32 %s287_s0, 4  ;;  %s221_s11 = int_to_ptr.vmem [resolvable:$true] %s220_s11 }
   0x7   :  { %v89_v5 = vmul.f32 3.5, %v25_v2  ;;  %v28_v8 = vld [vmem:[#allocation2 + $0x28] sm:$0xff]  ;;  %v90_v9 = vmul.f32 3.5, %v26_v6  ;;  %v29_v10 = vld [vmem:[#allocation2 + $0x30] sm:$0xff]  ;;  %v91_v11 = vmul.f32 3.5, %v27_v7  ;;  %v30_v12 = vld [vmem:[#allocation2 + $0x38] sm:$0xff] }
   0x8   :  { %151 = vst [vmem:[#allocation5] sm:$0xff] %v87_v3  ;;  %v92_v13 = vmul.f32 3.5, %v28_v8  ;;  %v31_v14 = vld [vmem:[#allocation2 + $0x40] sm:$0xff]  ;;  %v93_v15 = vmul.f32 3.5, %v29_v10  ;;  %v32_v16 = vld [vmem:[#allocation2 + $0x48] sm:$0xff]  ;;  %v94_v17 = vmul.f32 3.5, %v30_v12 }
   0x9   :  { %152 = vst [vmem:[#allocation5 + $0x8] sm:$0xff] %v88_v4  ;;  %v33_v18 = vld [vmem:[#allocation2 + $0x50] sm:$0xff]  ;;  %v95_v19 = vmul.f32 3.5, %v31_v14  ;;  %v34_v20 = vld [vmem:[#allocation2 + $0x58] sm:$0xff]  ;;  %v96_v21 = vmul.f32 3.5, %v32_v16  ;;  %v35_v22 = vld [vmem:[#allocation2 + $0x60] sm:$0xff] }
   0xa   :  { %153 = vst [vmem:[#allocation5 + $0x10] sm:$0xff] %v89_v5  ;;  %v97_v23 = vmul.f32 3.5, %v33_v18  ;;  %v36_v24 = vld [vmem:[#allocation2 + $0x68] sm:$0xff]  ;;  %v98_v25 = vmul.f32 3.5, %v34_v20  ;;  %v37_v26 = vld [vmem:[#allocation2 + $0x70] sm:$0xff]  ;;  %v99_v27 = vmul.f32 3.5, %v35_v22 }
   0xb   :  { %154 = vst [vmem:[#allocation5 + $0x18] sm:$0xff] %v90_v9  ;;  %v38_v28 = vld [vmem:[#allocation2 + $0x78] sm:$0xff]  ;;  %v100_v29 = vmul.f32 3.5, %v36_v24  ;;  %v39_v30 = vld [vmem:[#allocation2 + $0x80] sm:$0xff]  ;;  %v101_v31 = vmul.f32 3.5, %v37_v26  ;;  %v40_v32 = vld [vmem:[#allocation2 + $0x88] sm:$0xff] }
   0xc   :  { %155 = vst [vmem:[#allocation5 + $0x20] sm:$0xff] %v91_v11  ;;  %v102_v33 = vmul.f32 3.5, %v38_v28  ;;  %v41_v34 = vld [vmem:[#allocation2 + $0x90] sm:$0xff]  ;;  %v103_v35 = vmul.f32 3.5, %v39_v30  ;;  %v42_v36 = vld [vmem:[#allocation2 + $0x98] sm:$0xff]  ;;  %v104_v37 = vmul.f32 3.5, %v40_v32 }
   0xd   :  { %156 = vst [vmem:[#allocation5 + $0x28] sm:$0xff] %v92_v13  ;;  %v43_v38 = vld [vmem:[#allocation2 + $0xa0] sm:$0xff]  ;;  %v105_v39 = vmul.f32 3.5, %v41_v34  ;;  %v44_v40 = vld [vmem:[#allocation2 + $0xa8] sm:$0xff]  ;;  %v106_v41 = vmul.f32 3.5, %v42_v36  ;;  %v45_v42 = vld [vmem:[#allocation2 + $0xb0] sm:$0xff] }
   0xe   :  { %157 = vst [vmem:[#allocation5 + $0x30] sm:$0xff] %v93_v15  ;;  %v107_v43 = vmul.f32 3.5, %v43_v38  ;;  %v46_v44 = vld [vmem:[#allocation2 + $0xb8] sm:$0xff]  ;;  %v108_v45 = vmul.f32 3.5, %v44_v40  ;;  %v47_v46 = vld [vmem:[#allocation2 + $0xc0] sm:$0xff]  ;;  %v109_v47 = vmul.f32 3.5, %v45_v42 }
   0xf   :  { %158 = vst [vmem:[#allocation5 + $0x38] sm:$0xff] %v94_v17  ;;  %v48_v48 = vld [vmem:[#allocation2 + $0xc8] sm:$0xff]  ;;  %v110_v49 = vmul.f32 3.5, %v46_v44  ;;  %v49_v50 = vld [vmem:[#allocation2 + $0xd0] sm:$0xff]  ;;  %v111_v51 = vmul.f32 3.5, %v47_v46  ;;  %v50_v52 = vld [vmem:[#allocation2 + $0xd8] sm:$0xff] }
  0x10   :  { %159 = vst [vmem:[#allocation5 + $0x40] sm:$0xff] %v95_v19  ;;  %v112_v53 = vmul.f32 3.5, %v48_v48  ;;  %v51_v54 = vld [vmem:[#allocation2 + $0xe0] sm:$0xff]  ;;  %v113_v55 = vmul.f32 3.5, %v49_v50  ;;  %v52_v56 = vld [vmem:[#allocation2 + $0xe8] sm:$0xff]  ;;  %v114_v57 = vmul.f32 3.5, %v50_v52 }
  0x11   :  { %160 = vst [vmem:[#allocation5 + $0x48] sm:$0xff] %v96_v21  ;;  %v53_v58 = vld [vmem:[#allocation2 + $0xf0] sm:$0xff]  ;;  %v115_v59 = vmul.f32 3.5, %v51_v54  ;;  %v54_v60 = vld [vmem:[#allocation2 + $0xf8] sm:$0xff]  ;;  %v116_v61 = vmul.f32 3.5, %v52_v56  ;;  %v55_v62 = vld [vmem:[#allocation2 + $0x100] sm:$0xff] }
  0x12   :  { %161 = vst [vmem:[#allocation5 + $0x50] sm:$0xff] %v97_v23  ;;  %v117_v63 = vmul.f32 3.5, %v53_v58  ;;  %v56_v0 = vld [vmem:[#allocation2 + $0x108] sm:$0xff]  ;;  %v118_v1 = vmul.f32 3.5, %v54_v60  ;;  %v57_v2 = vld [vmem:[#allocation2 + $0x110] sm:$0xff]  ;;  %v119_v3 = vmul.f32 3.5, %v55_v62 }
  0x13   :  { %162 = vst [vmem:[#allocation5 + $0x58] sm:$0xff] %v98_v25  ;;  %v58_v4 = vld [vmem:[#allocation2 + $0x118] sm:$0xff]  ;;  %v120_v5 = vmul.f32 3.5, %v56_v0  ;;  %v59_v6 = vld [vmem:[#allocation2 + $0x120] sm:$0xff]  ;;  %v121_v7 = vmul.f32 3.5, %v57_v2  ;;  %v60_v8 = vld [vmem:[#allocation2 + $0x128] sm:$0xff] }
  0x14   :  { %163 = vst [vmem:[#allocation5 + $0x60] sm:$0xff] %v99_v27  ;;  %v122_v9 = vmul.f32 3.5, %v58_v4  ;;  %v61_v10 = vld [vmem:[#allocation2 + $0x130] sm:$0xff]  ;;  %v123_v11 = vmul.f32 3.5, %v59_v6  ;;  %v62_v12 = vld [vmem:[#allocation2 + $0x138] sm:$0xff]  ;;  %v124_v13 = vmul.f32 3.5, %v60_v8 }
  0x15   :  { %164 = vst [vmem:[#allocation5 + $0x68] sm:$0xff] %v100_v29  ;;  %v63_v14 = vld [vmem:[#allocation2 + $0x140] sm:$0xff]  ;;  %v125_v15 = vmul.f32 3.5, %v61_v10  ;;  %v64_v16 = vld [vmem:[#allocation2 + $0x148] sm:$0xff]  ;;  %v126_v17 = vmul.f32 3.5, %v62_v12  ;;  %v65_v18 = vld [vmem:[#allocation2 + $0x150] sm:$0xff] }
  0x16   :  { %165 = vst [vmem:[#allocation5 + $0x70] sm:$0xff] %v101_v31  ;;  %v127_v19 = vmul.f32 3.5, %v63_v14  ;;  %v66_v20 = vld [vmem:[#allocation2 + $0x158] sm:$0xff]  ;;  %v128_v21 = vmul.f32 3.5, %v64_v16  ;;  %v67_v22 = vld [vmem:[#allocation2 + $0x160] sm:$0xff]  ;;  %v129_v23 = vmul.f32 3.5, %v65_v18 }
  0x17   :  { %166 = vst [vmem:[#allocation5 + $0x78] sm:$0xff] %v102_v33  ;;  %v68_v24 = vld [vmem:[#allocation2 + $0x168] sm:$0xff]  ;;  %v130_v25 = vmul.f32 3.5, %v66_v20  ;;  %v69_v26 = vld [vmem:[#allocation2 + $0x170] sm:$0xff]  ;;  %v131_v27 = vmul.f32 3.5, %v67_v22  ;;  %v70_v28 = vld [vmem:[#allocation2 + $0x178] sm:$0xff] }
  0x18   :  { %167 = vst [vmem:[#allocation5 + $0x80] sm:$0xff] %v103_v35  ;;  %v132_v29 = vmul.f32 3.5, %v68_v24  ;;  %v71_v30 = vld [vmem:[#allocation2 + $0x180] sm:$0xff]  ;;  %v133_v31 = vmul.f32 3.5, %v69_v26  ;;  %v72_v32 = vld [vmem:[#allocation2 + $0x188] sm:$0xff]  ;;  %v134_v33 = vmul.f32 3.5, %v70_v28 }
  0x19   :  { %168 = vst [vmem:[#allocation5 + $0x88] sm:$0xff] %v104_v37  ;;  %v73_v34 = vld [vmem:[#allocation2 + $0x190] sm:$0xff]  ;;  %v135_v35 = vmul.f32 3.5, %v71_v30  ;;  %v74_v36 = vld [vmem:[#allocation2 + $0x198] sm:$0xff]  ;;  %v136_v37 = vmul.f32 3.5, %v72_v32  ;;  %v75_v38 = vld [vmem:[#allocation2 + $0x1a0] sm:$0xff] }
  0x1a   :  { %169 = vst [vmem:[#allocation5 + $0x90] sm:$0xff] %v105_v39  ;;  %v137_v39 = vmul.f32 3.5, %v73_v34  ;;  %v76_v40 = vld [vmem:[#allocation2 + $0x1a8] sm:$0xff]  ;;  %v77_v42 = vld [vmem:[#allocation2 + $0x1b0] sm:$0xff]  ;;  %v78_v44 = vld [vmem:[#allocation2 + $0x1b8] sm:$0xff] }
  0x1b   :  { %170 = vst [vmem:[#allocation5 + $0x98] sm:$0xff] %v106_v41  ;;  %v138_v41 = vmul.f32 3.5, %v74_v36  ;;  %v79_v46 = vld [vmem:[#allocation2 + $0x1c0] sm:$0xff]  ;;  %v80_v48 = vld [vmem:[#allocation2 + $0x1c8] sm:$0xff]  ;;  %v81_v50 = vld [vmem:[#allocation2 + $0x1d0] sm:$0xff] }
  0x1c   :  { %171 = vst [vmem:[#allocation5 + $0xa0] sm:$0xff] %v107_v43  ;;  %v139_v43 = vmul.f32 3.5, %v75_v38  ;;  %v82_v52 = vld [vmem:[#allocation2 + $0x1d8] sm:$0xff]  ;;  %v83_v54 = vld [vmem:[#allocation2 + $0x1e0] sm:$0xff]  ;;  %v84_v56 = vld [vmem:[#allocation2 + $0x1e8] sm:$0xff] }
  0x1d   :  { %172 = vst [vmem:[#allocation5 + $0xa8] sm:$0xff] %v108_v45  ;;  %v140_v45 = vmul.f32 3.5, %v76_v40  ;;  %v85_v58 = vld [vmem:[#allocation2 + $0x1f0] sm:$0xff]  ;;  %v86_v60 = vld [vmem:[#allocation2 + $0x1f8] sm:$0xff] }
  0x1e   :  { %173 = vst [vmem:[#allocation5 + $0xb0] sm:$0xff] %v109_v47  ;;  %v141_v47 = vmul.f32 3.5, %v77_v42  ;;  %v149_v62 = vmul.f32 3.5, %v85_v58 }
  0x1f   :  { %174 = vst [vmem:[#allocation5 + $0xb8] sm:$0xff] %v110_v49  ;;  %v142_v49 = vmul.f32 3.5, %v78_v44 }
  0x20   :  { %175 = vst [vmem:[#allocation5 + $0xc0] sm:$0xff] %v111_v51  ;;  %v143_v51 = vmul.f32 3.5, %v79_v46 }
  0x21   :  { %176 = vst [vmem:[#allocation5 + $0xc8] sm:$0xff] %v112_v53  ;;  %v144_v53 = vmul.f32 3.5, %v80_v48 }
  0x22   :  { %177 = vst [vmem:[#allocation5 + $0xd0] sm:$0xff] %v113_v55  ;;  %v145_v55 = vmul.f32 3.5, %v81_v50 }
  0x23   :  { %178 = vst [vmem:[#allocation5 + $0xd8] sm:$0xff] %v114_v57  ;;  %v146_v57 = vmul.f32 3.5, %v82_v52 }
  0x24   :  { %179 = vst [vmem:[#allocation5 + $0xe0] sm:$0xff] %v115_v59  ;;  %v147_v59 = vmul.f32 3.5, %v83_v54 }
  0x25   :  { %180 = vst [vmem:[#allocation5 + $0xe8] sm:$0xff] %v116_v61  ;;  %v148_v61 = vmul.f32 3.5, %v84_v56 }
  0x26   :  { %181 = vst [vmem:[#allocation5 + $0xf0] sm:$0xff] %v117_v63  ;;  %v150_v63 = vmul.f32 3.5, %v86_v60 }
  0x27   :  { %182 = vst [vmem:[#allocation5 + $0xf8] sm:$0xff] %v118_v1 }
  0x28   :  { %183 = vst [vmem:[#allocation5 + $0x100] sm:$0xff] %v119_v3 }
  0x29   :  { %184 = vst [vmem:[#allocation5 + $0x108] sm:$0xff] %v120_v5 }
  0x2a   :  { %185 = vst [vmem:[#allocation5 + $0x110] sm:$0xff] %v121_v7 }
  0x2b   :  { %186 = vst [vmem:[#allocation5 + $0x118] sm:$0xff] %v122_v9 }
  0x2c   :  { %187 = vst [vmem:[#allocation5 + $0x120] sm:$0xff] %v123_v11 }
  0x2d   :  { %188 = vst [vmem:[#allocation5 + $0x128] sm:$0xff] %v124_v13 }
  0x2e   :  { %189 = vst [vmem:[#allocation5 + $0x130] sm:$0xff] %v125_v15 }
  0x2f   :  { %190 = vst [vmem:[#allocation5 + $0x138] sm:$0xff] %v126_v17 }
  0x30   :  { %191 = vst [vmem:[#allocation5 + $0x140] sm:$0xff] %v127_v19 }
  0x31   :  { %192 = vst [vmem:[#allocation5 + $0x148] sm:$0xff] %v128_v21 }
  0x32   :  { %193 = vst [vmem:[#allocation5 + $0x150] sm:$0xff] %v129_v23 }
  0x33   :  { %194 = vst [vmem:[#allocation5 + $0x158] sm:$0xff] %v130_v25 }
  0x34   :  { %195 = vst [vmem:[#allocation5 + $0x160] sm:$0xff] %v131_v27 }
  0x35   :  { %196 = vst [vmem:[#allocation5 + $0x168] sm:$0xff] %v132_v29 }
  0x36   :  { %197 = vst [vmem:[#allocation5 + $0x170] sm:$0xff] %v133_v31 }
  0x37   :  { %198 = vst [vmem:[#allocation5 + $0x178] sm:$0xff] %v134_v33 }
  0x38   :  { %199 = vst [vmem:[#allocation5 + $0x180] sm:$0xff] %v135_v35 }
  0x39   :  { %200 = vst [vmem:[#allocation5 + $0x188] sm:$0xff] %v136_v37 }
  0x3a   :  { %201 = vst [vmem:[#allocation5 + $0x190] sm:$0xff] %v137_v39 }
  0x3b   :  { %202 = vst [vmem:[#allocation5 + $0x198] sm:$0xff] %v138_v41 }
  0x3c   :  { %203 = vst [vmem:[#allocation5 + $0x1a0] sm:$0xff] %v139_v43 }
  0x3d   :  { %204 = vst [vmem:[#allocation5 + $0x1a8] sm:$0xff] %v140_v45 }
  0x3e   :  { %205 = vst [vmem:[#allocation5 + $0x1b0] sm:$0xff] %v141_v47 }
  0x3f   :  { %206 = vst [vmem:[#allocation5 + $0x1b8] sm:$0xff] %v142_v49 }
  0x40   :  { %207 = vst [vmem:[#allocation5 + $0x1c0] sm:$0xff] %v143_v51 }
  0x41   :  { %208 = vst [vmem:[#allocation5 + $0x1c8] sm:$0xff] %v144_v53 }
  0x42   :  { %209 = vst [vmem:[#allocation5 + $0x1d0] sm:$0xff] %v145_v55 }
  0x43   :  { %210 = vst [vmem:[#allocation5 + $0x1d8] sm:$0xff] %v146_v57 }
  0x44   :  { %211 = vst [vmem:[#allocation5 + $0x1e0] sm:$0xff] %v147_v59 }
  0x45   :  { %212 = vst [vmem:[#allocation5 + $0x1e8] sm:$0xff] %v148_v61 }
  0x46   :  { %213 = vst [vmem:[#allocation5 + $0x1f0] sm:$0xff] %v149_v62 }
  0x47   :  { %214 = vst [vmem:[#allocation5 + $0x1f8] sm:$0xff] %v150_v63 }
  0x48   :  { %225 = dma.vmem_to_hbm [thread:$0]  %s221_s11, 8192, %s223_s14, [#allocation4]  }
  0x49   :  { %284 = dma.done.wait [#allocation4], 8192  }
  0x4a   :  { %285 = vsyncadd [#allocation4], 4294959104 }
  0x4b   :  { %230 = vsyncpa [#allocation3], 1 }
  0x4c   :  { %231 = vsyncpa [#allocation4], 1 }

</bundles_post_ra>
